<compile_context>
chip_gen: v6e
topology: v6e:2x2x1
jax: 0.10.0
libtpu: 0.0.40
codegen_flags: <defaults>
</compile_context>

<pallas_src>
import jax
import jax.numpy as jnp
from jax.experimental import pallas as pl
from jax.experimental.pallas import tpu as pltpu


def downblock_kernel(x_ref, w_ref, b_ref, o_ref):
    """Fused 1x1-conv + 2x2 max-pool, transposed (channels-on-sublanes) layout.

    x_ref: (1, 4, Cin, Pt)  -- axis 1 = the 4 positions of each 2x2 pooling window
    w_ref: (Cout, Cin)
    b_ref: (Cout, 1)        -- f32, added once after the max
    o_ref: (1, Cout, Pt)    -- Pt on lanes => lane-dense stores
    """
    w = w_ref[...]
    # Window position 0 seeds the running max (no -inf init needed).
    m = jnp.dot(w, x_ref[0, 0], preferred_element_type=jnp.float32)
    # Remaining 3 positions: each dot has N = Pt (lane-dense MXU result width).
    # NOTE: for very small Cin/Cout a pure-VPU broadcast-MAC variant would avoid
    # the underutilized MXU entirely; the MXU path is kept as the kernel is
    # HBM-bandwidth bound and this form lowers robustly for all block sizes.
    for k in range(1, 4):
        m = jnp.maximum(m, jnp.dot(w, x_ref[0, k],
                                   preferred_element_type=jnp.float32))
    o_ref[0] = (m + b_ref[...]).astype(o_ref.dtype)


def _pick_p_tile(P, Cin, Cout, x_bytes, vmem_budget_bytes):
    """Largest multiple-of-128 spatial tile whose double-buffered footprint fits
    the budget (budget chosen to be safe on v5e's 16 MiB scoped default and
    v7x's 64 MiB physical VMEM)."""
    bytes_per_p = 2 * (4 * Cin * x_bytes) + 2 * (Cout * 4)  # 2x-buffered in + out
    pt = (vmem_budget_bytes // bytes_per_p) // 128 * 128
    pt = max(128, pt)
    return min(pt, P)


def downblock(x_nchw, weight, bias, *, compute_dtype=None,
              vmem_budget_bytes=8 * 1024 * 1024):
    """x_nchw: (N, Cin, H, W); weight: (Cout, Cin, 1, 1); bias: (Cout,)."""
    N, Cin, H, W = x_nchw.shape
    Cout = weight.shape[0]
    assert H % 2 == 0 and W % 2 == 0
    Ho, Wo = H // 2, W // 2
    P = Ho * Wo
    out_dtype = x_nchw.dtype

    if compute_dtype is None:
        # bf16 activations/weights for the wide-channel blocks (halves HBM bytes
        # on this memory-bound op; v6e/v7x MXU native bf16).  Keep f32 for the
        # tiny first block.
        compute_dtype = jnp.bfloat16 if (Cin >= 32 and Cout >= 32) else jnp.float32

    # --- single HBM rearrangement pass: NCHW -> (N, 4, Cin, P), k = 2*dh + dw.
    xw = x_nchw.reshape(N, Cin, Ho, 2, Wo, 2)
    xw = jnp.transpose(xw, (0, 3, 5, 1, 2, 4))            # (N, 2, 2, Cin, Ho, Wo)
    xw = xw.reshape(N, 4, Cin, P).astype(compute_dtype)

    w2d = weight.reshape(Cout, Cin).astype(compute_dtype)  # (Cout, Cin)
    b2d = bias.reshape(Cout, 1).astype(jnp.float32)        # (Cout, 1)

    x_bytes = jnp.dtype(compute_dtype).itemsize
    pt = _pick_p_tile(P, Cin, Cout, x_bytes, vmem_budget_bytes)
    grid = (N, pl.cdiv(P, pt))

    out = pl.pallas_call(
        downblock_kernel,
        out_shape=jax.ShapeDtypeStruct((N, Cout, P), out_dtype),
        grid_spec=pltpu.PrefetchScalarGridSpec(
            num_scalar_prefetch=0,
            grid=grid,
            in_specs=[
                pl.BlockSpec((1, 4, Cin, pt), lambda n, p: (n, 0, 0, p)),
                pl.BlockSpec((Cout, Cin), lambda n, p: (0, 0)),
                pl.BlockSpec((Cout, 1), lambda n, p: (0, 0)),
            ],
            out_specs=pl.BlockSpec((1, Cout, pt), lambda n, p: (n, 0, p)),
        ),
        compiler_params=pltpu.CompilerParams(
            dimension_semantics=("parallel", "parallel"),
            vmem_limit_bytes=32 * 1024 * 1024,
        ),
    )(xw, w2d, b2d)

    # (N, Cout, P) -> NCHW is a pure reshape: no post-kernel transpose pass.
    return out.reshape(N, Cout, Ho, Wo)


def downblock_ref(x_nchw, weight, bias):
    """Pure-JAX reference of the PyTorch forward (conv1x1 then maxpool2d(2))."""
    N, Cin, H, W = x_nchw.shape
    Cout = weight.shape[0]
    w2d = weight.reshape(Cout, Cin)
    y = jnp.einsum("nchw,oc->nohw", x_nchw, w2d) + bias[None, :, None, None]
    y = y.reshape(N, Cout, H // 2, 2, W // 2, 2)
    return jnp.max(jnp.max(y, axis=5), axis=3)


if __name__ == "__main__":
    key = jax.random.PRNGKey(0)
    k_x, k_w, k_b, k_x2, k_w2, k_b2 = jax.random.split(key, 6)

    # --- Test 1: first ResUNet DownBlock shape (tiny channels), f32 end to end.
    N, Cin, H, W, Cout = 2, 4, 16, 16, 8
    x = jax.random.normal(k_x, (N, Cin, H, W), dtype=jnp.float32)
    weight = jax.random.normal(k_w, (Cout, Cin, 1, 1), dtype=jnp.float32) * 0.1
    bias = jax.random.normal(k_b, (Cout,), dtype=jnp.float32) * 0.1

    out = jax.block_until_ready(downblock(x, weight, bias,
                                          compute_dtype=jnp.float32))
    ref = downblock_ref(x, weight, bias)
    assert out.shape == (N, Cout, H // 2, W // 2), out.shape
    assert jnp.allclose(out, ref, atol=1e-5, rtol=1e-5), "mismatch vs reference (f32)"

    # --- Test 2: a deeper DownBlock shape on the bf16 (v6e/v7x) path.
    N2, Cin2, H2, W2, Cout2 = 1, 32, 32, 32, 64
    x2 = jax.random.normal(k_x2, (N2, Cin2, H2, W2), dtype=jnp.float32)
    w2 = jax.random.normal(k_w2, (Cout2, Cin2, 1, 1), dtype=jnp.float32) * 0.1
    b2 = jax.random.normal(k_b2, (Cout2,), dtype=jnp.float32) * 0.1

    out2 = jax.block_until_ready(downblock(x2, w2, b2,
                                           compute_dtype=jnp.bfloat16))
    ref2 = downblock_ref(x2, w2, b2)
    assert out2.shape == (N2, Cout2, H2 // 2, W2 // 2), out2.shape
    assert jnp.allclose(out2, ref2, atol=5e-2, rtol=5e-2), "mismatch vs reference (bf16)"

    print("KERNEL_OK")
</pallas_src>

<mosaic_0001>
module attributes {stable_mosaic.version = 11 : i64} {
  func.func @downblock_kernel(%arg0: i32, %arg1: i32, %arg2: memref<1x4x4x64xf32, #tpu.memory_space<vmem>>, %arg3: memref<8x4xf32, #tpu.memory_space<vmem>>, %arg4: memref<8x1xf32, #tpu.memory_space<vmem>>, %arg5: memref<1x8x64xf32, #tpu.memory_space<vmem>>) attributes {dimension_semantics = [#tpu.dimension_semantics<parallel>, #tpu.dimension_semantics<parallel>], iteration_bounds = array<i64: 2, 1>, scalar_prefetch = 0 : i64, scratch_operands = 0 : i64, tpu.core_type = #tpu.core_type<tc>, window_params = [{transform_indices = @transform_0, window_bounds = array<i64: 1, 4, 4, 64>}, {pipeline_mode = #tpu.pipeline_mode<synchronous>, transform_indices = @transform_1, window_bounds = array<i64: 8, 4>}, {pipeline_mode = #tpu.pipeline_mode<synchronous>, transform_indices = @transform_2, window_bounds = array<i64: 8, 1>}, {transform_indices = @transform_3, window_bounds = array<i64: 1, 8, 64>}]} {
    %c0 = arith.constant 0 : index
    %c0_0 = arith.constant 0 : index
    %0 = vector.load %arg3[%c0, %c0_0] : memref<8x4xf32, #tpu.memory_space<vmem>>, vector<8x4xf32>
    %c0_1 = arith.constant 0 : index
    %c0_2 = arith.constant 0 : index
    %c0_3 = arith.constant 0 : index
    %c0_4 = arith.constant 0 : index
    %1 = vector.load %arg2[%c0_1, %c0_2, %c0_3, %c0_4] : memref<1x4x4x64xf32, #tpu.memory_space<vmem>>, vector<1x1x4x64xf32>
    %2 = vector.shape_cast %1 : vector<1x1x4x64xf32> to vector<4x64xf32>
    %cst = arith.constant dense<0.000000e+00> : vector<8x64xf32>
    %3 = tpu.matmul %0, %2, %cst {dimension_numbers = #tpu.dot_dimension_numbers<[1], [0], [0], [1], [0, 0, 1, 1], [], []>} : vector<8x4xf32>, vector<4x64xf32>, vector<8x64xf32> -> vector<8x64xf32>
    %c0_5 = arith.constant 0 : index
    %c1 = arith.constant 1 : index
    %c0_6 = arith.constant 0 : index
    %c0_7 = arith.constant 0 : index
    %4 = vector.load %arg2[%c0_5, %c1, %c0_6, %c0_7] : memref<1x4x4x64xf32, #tpu.memory_space<vmem>>, vector<1x1x4x64xf32>
    %5 = vector.shape_cast %4 : vector<1x1x4x64xf32> to vector<4x64xf32>
    %cst_8 = arith.constant dense<0.000000e+00> : vector<8x64xf32>
    %6 = tpu.matmul %0, %5, %cst_8 {dimension_numbers = #tpu.dot_dimension_numbers<[1], [0], [0], [1], [0, 0, 1, 1], [], []>} : vector<8x4xf32>, vector<4x64xf32>, vector<8x64xf32> -> vector<8x64xf32>
    %7 = arith.maximumf %3, %6 : vector<8x64xf32>
    %c0_9 = arith.constant 0 : index
    %c2 = arith.constant 2 : index
    %c0_10 = arith.constant 0 : index
    %c0_11 = arith.constant 0 : index
    %8 = vector.load %arg2[%c0_9, %c2, %c0_10, %c0_11] : memref<1x4x4x64xf32, #tpu.memory_space<vmem>>, vector<1x1x4x64xf32>
    %9 = vector.shape_cast %8 : vector<1x1x4x64xf32> to vector<4x64xf32>
    %cst_12 = arith.constant dense<0.000000e+00> : vector<8x64xf32>
    %10 = tpu.matmul %0, %9, %cst_12 {dimension_numbers = #tpu.dot_dimension_numbers<[1], [0], [0], [1], [0, 0, 1, 1], [], []>} : vector<8x4xf32>, vector<4x64xf32>, vector<8x64xf32> -> vector<8x64xf32>
    %11 = arith.maximumf %7, %10 : vector<8x64xf32>
    %c0_13 = arith.constant 0 : index
    %c3 = arith.constant 3 : index
    %c0_14 = arith.constant 0 : index
    %c0_15 = arith.constant 0 : index
    %12 = vector.load %arg2[%c0_13, %c3, %c0_14, %c0_15] : memref<1x4x4x64xf32, #tpu.memory_space<vmem>>, vector<1x1x4x64xf32>
    %13 = vector.shape_cast %12 : vector<1x1x4x64xf32> to vector<4x64xf32>
    %cst_16 = arith.constant dense<0.000000e+00> : vector<8x64xf32>
    %14 = tpu.matmul %0, %13, %cst_16 {dimension_numbers = #tpu.dot_dimension_numbers<[1], [0], [0], [1], [0, 0, 1, 1], [], []>} : vector<8x4xf32>, vector<4x64xf32>, vector<8x64xf32> -> vector<8x64xf32>
    %15 = arith.maximumf %11, %14 : vector<8x64xf32>
    %c0_17 = arith.constant 0 : index
    %c0_18 = arith.constant 0 : index
    %16 = vector.load %arg4[%c0_17, %c0_18] : memref<8x1xf32, #tpu.memory_space<vmem>>, vector<8x1xf32>
    %17 = vector.broadcast %16 : vector<8x1xf32> to vector<8x64xf32>
    %18 = arith.addf %15, %17 : vector<8x64xf32>
    %c0_19 = arith.constant 0 : index
    %c0_20 = arith.constant 0 : index
    %c0_21 = arith.constant 0 : index
    %19 = vector.load %arg5[%c0_19, %c0_20, %c0_21] : memref<1x8x64xf32, #tpu.memory_space<vmem>>, vector<1x8x64xf32>
    %20 = vector.shape_cast %19 : vector<1x8x64xf32> to vector<8x64xf32>
    %21 = vector.shape_cast %18 : vector<8x64xf32> to vector<1x8x64xf32>
    tpu.vector_store %arg5[%c0_19, %c0_20, %c0_21], %21 {strides = array<i32>} : memref<1x8x64xf32, #tpu.memory_space<vmem>>, vector<1x8x64xf32>,
    return
  }
  func.func @transform_0(%arg0: i32, %arg1: i32) -> (i32, i32, i32, i32) {
    %c0_i32 = arith.constant 0 : i32
    %c0_i32_0 = arith.constant 0 : i32
    %c0_i32_1 = arith.constant 0 : i32
    return %arg0, %c0_i32, %c0_i32_0, %arg1 : i32, i32, i32, i32
  }
  func.func @transform_1(%arg0: i32, %arg1: i32) -> (i32, i32) {
    %c0_i32 = arith.constant 0 : i32
    %c0_i32_0 = arith.constant 0 : i32
    %c0_i32_1 = arith.constant 0 : i32
    return %c0_i32, %c0_i32_0 : i32, i32
  }
  func.func @transform_2(%arg0: i32, %arg1: i32) -> (i32, i32) {
    %c0_i32 = arith.constant 0 : i32
    %c0_i32_0 = arith.constant 0 : i32
    %c0_i32_1 = arith.constant 0 : i32
    return %c0_i32, %c0_i32_0 : i32, i32
  }
  func.func @transform_3(%arg0: i32, %arg1: i32) -> (i32, i32, i32) {
    %c0_i32 = arith.constant 0 : i32
    %c0_i32_0 = arith.constant 0 : i32
    return %arg0, %c0_i32, %arg1 : i32, i32, i32
  }
}

</mosaic_0001>

<bundles_post_ra>
// kernel: tpu_custom_call.1
= control target key start
LH: loop header
LB: loop body
LE: loop exit
PB: predicated region body
PF: predicated region fallthrough
CT: control target
= control target key end

     0   :  { %8 = vsyncpa [#allocation3], 0  ;;  %s1029_s0 = inlined_call_operand.hbm [shape: f32[2,4,4,64], index: 0, kind: input, shape index: {}]   ;;  %s1030_s1 = inlined_call_operand.vmem [shape: f32[8,4], index: 1, kind: input, shape index: {}]   ;;  %s1031_s2 = inlined_call_operand.vmem [shape: f32[8,1], index: 2, kind: input, shape index: {}]   ;;  %s1032_s3 = inlined_call_operand.hbm [shape: f32[2,8,64], index: 3, kind: output, shape index: {}]  }
   0x1   :  { %10 = vsyncpa [#allocation3 + $0x1], 0 }
   0x2   :  { %11 = vsyncpa [#allocation4], 0 }
   0x3   :  { %13 = vsyncpa [#allocation4 + $0x1], 0  ;;  %s878_s12 = smov 0   ;;  %s880_s13 = smov 0  }
   0x4   :  { %s882_s14 = smov 0   ;;  %s884_s15 = smov 0  }
   0x5   :  { %s886_s16 = smov 0   ;;  %s888_s17 = smov 0  }
   0x6 LB: > { %s619_s18 = sadd.s32 4294967295, %s849_s17   ;;  %s620_s19 = sadd.s32 4294967294, %s849_s17   ;;  %s849_s17 = sphi %s888_s17, %s19_s17   ;;  %s845_s16 = sphi %s886_s16, %s1043_s16   ;;  %s841_s15 = sphi %s884_s15, %s1042_s15   ;;  %s837_s14 = sphi %s882_s14, %s1041_s14   ;;  %s833_s13 = sphi %s880_s13, %s1040_s13   ;;  %s829_s12 = sphi %s878_s12, %s1039_s12  }
   0x7   : > { %s31_s20 = sadd.s32 1, %s845_s16  ;;  %s40_s21 = sadd.s32 1, %s837_s14 }
   0x8   : > { %p33_p0 = scmp.ge.s32.totalorder %s31_s20, 2  ;;  %p47_p1 = scmp.ne.s32.totalorder %s837_s14, %s833_s13 }
   0x9   : > { %p48_p2 = scmp.eq.s32.totalorder %s849_s17, 0  ;;  %p53_p3 = scmp.ne.s32.totalorder %s833_s13, %s829_s12 }
   0xa   : > { %s1045_s20 = smov (%p33_p0, %s31_s20), 0  ;;  %p54_p5 = scmp.eq.s32.totalorder %s619_s18, 0 }
   0xb   : > { %p919_p4 = por %p48_p2, %p47_p1  ;;  %s35_s23 = ssub.s32 %s845_s16, %s1045_s20 }
   0xc   : > { %p121_p6 = scmp.eq.s32.totalorder %s619_s18, 1  ;;  %p38_p7 = scmp.eq.s32.totalorder %s35_s23, 0 }
   0xd   : > { %p925_p8 = por %p54_p5, %p53_p3  ;;  %p127_p10 = scmp.eq.s32.totalorder %s620_s19, 1 }
   0xe   : > { %p929_p9 = por %p121_p6, %p47_p1  ;;  %p685_p13 = scmp.lt.s32.totalorder %s849_s17, 2 }
   0xf   : > { %s934_s26 = scalar_select %p38_p7, %s837_s14, %s40_s21  }
  0x10   : > { %p936_p11 = por %p127_p10, %p53_p3  ;;  %s153_s28 = sand.u32 1, %s837_s14  }
  0x11   : > { %s623_s29 = sshll.u32 %s153_s28, 4  ;;  %s644_s30 = sshll.u32 %s845_s16, 8 }
  0x12   : > { %s164_s6 = scalar_lea.hbm %s1029_s0, %s644_s30  ;;  %s157_s7 = scalar_lea.vmem [#allocation2], %s623_s29 }
  0x13   : > { %s165_s8 = sshll.u32 %s157_s7, 4  ;;  %p949_p0 = pnand %p685_p13, %p919_p4  ;;  %s166_s8 = int_to_ptr.vmem [resolvable:$true] %s165_s8 }
  0x14   : > { %p626_p1 = scmp.ge.s32.totalorder %s849_s17, 1  ;;  %s154_s10 = scalar_lea.sflag [#allocation3], %s153_s28 }
  0x15   : > { %p743_p2 = pneg %p949_p0  ;;  %s754_s11 = scalar_lea.vmem %s166_s8, 256 }
  0x16   : > { %p755_p3 = scmp.ne.s32.totalorder %s166_s8, %s754_s11  ;;  %s851_s18 = smov [#allocation2]  }
  0x17   : > { %s759_s19 = sshll.u32 %s851_s18, 4  ;;  %s760_s19 = int_to_ptr.vmem [resolvable:$false] %s759_s19 }
  0x18   : > { %p757_p5 = pnand %p755_p3, %p743_p2  ;;  %s761_s21 = scalar_lea.vmem %s760_s19, 512 }
  0x19   : > { %p762_p7 = scmp.lt.s32.totalorder %s166_s8, %s760_s19  ;;  %p763_p10 = scmp.lt.s32.totalorder %s761_s21, %s754_s11 }
  0x1a   : > { %p758_p6 = pneg %p757_p5 }
  0x1b   : > { %p764_p12 = por %p763_p10, %p762_p7 }
  0x1d   : > { %p765_p4 = pnand %p764_p12, %p758_p6 }
  0x1f   : > { %768 = shalt.err (!%p765_p4)
}
  0x20   : > { %s852_s22 = smov 64   ;;  %s853_s23 = smov 4  }
  0x21   : > { %680 = dma.hbm_to_vmem [thread:$0]  (!%p949_p0), %s164_s6, 256, %s166_s8, %s154_s10, %s852_s22, %s852_s22, %s853_s23  }
  0x22   : > { %p173_p13 = scmp.lt.s32.totalorder %s849_s17, 3 }
  0x24   : > { %p174_p2 = pnand %p626_p1, %p173_p13 }
  0x25   : > { %s962_s28 = sand.u32 (!%p174_p2), 1, %s833_s13  }
  0x26   : > { %177 = sbr.rel (%p174_p2) target bundleno = 264 (0x108), region = 32  ;;  %s627_s29 = sshll.u32 (!%p174_p2), %s962_s28, 4 }
  0x27   : > { %s180_s30 = scalar_lea.sflag (!%p174_p2), [#allocation3], %s962_s28  ;;  %s183_s4 = scalar_lea.vmem (!%p174_p2), [#allocation2], %s627_s29 }
  0x2b   : > { %820 = dma.done.wait (%p925_p8), %s180_s30, 256  }
  0x2c   : > { %822 = vsyncadd (%p925_p8), %s180_s30, 4294967040  ;;  %v854_v0 = vmov 0.0   ;;  %vm855_vm0 = vmmov 0   ;;  %v856_v1 = vmov 0   ;;  %vm212_vm1 = vcmask 1043456   ;;  %v206_v3 = vld [vmem:[%s1030_s1] sm:$0xff] }
  0x2d   : > { %653 = vmatprep.subr.mxu0 %v854_v0  ;;  %655 = vmatprep.mubr.msk.f32.mxu0 %vm855_vm0, %v854_v0  ;;  %vm208_vm2 = vcmask 31744   ;;  %v207_v2 = vld [vmem:[%s183_s4] sm:$0xf]  ;;  %v631_v4 = vld [vmem:[%s183_s4 + $0x4] sm:$0xf]  ;;  %s628_s8 = sshll.u32 %s962_s28, 3 }
  0x2e   : > { %658 = vmatprep.subr.mxu1 %v854_v0  ;;  %660 = vmatprep.mubr.msk.f32.mxu1 %vm855_vm0, %v854_v0  ;;  %v634_v5 = vld [vmem:[%s183_s4 + $0x8] sm:$0xf]  ;;  %v637_v6 = vld [vmem:[%s183_s4 + $0xc] sm:$0xf]  ;;  %v514_v7 = vld [vmem:[%s1031_s2] sm:$0xff]  ;;  %s641_s9 = sshll.u32 %s841_s15, 7 }
  0x2f   : > { %740 = vset.pattern.permute.xlu0 %v856_v1  ;;  %654 = vmatpush3.msk.msra.mxu0 %vm212_vm1, %v207_v2  ;;  %s205_s10 = scalar_lea.vmem [#allocation5], %s628_s8  ;;  %vm521_vm3 = vcmask 523264   ;;  %s536_s21 = scalar_lea.hbm %s1032_s3, %s641_s9 }
  0x30   : > { %659 = vmatpush3.msk.msra.mxu1 %vm212_vm1, %v631_v4  ;;  %656 = vmatmul.mubr.msk.f32.vlgmr.msra.gmra.mxu0 %vm208_vm2, %v206_v3  ;;  %s538_s11 = sshll.u32 %s205_s10, 4  ;;  %s524_s22 = scalar_lea.sflag [#allocation4], %s962_s28  ;;  %s539_s11 = int_to_ptr.vmem [resolvable:$true] %s538_s11 }
  0x31   : > { %663 = vmatprep.subr.mxu0 %v854_v0  ;;  %661 = vmatmul.mubr.msk.f32.vlgmr.msra.gmra.mxu1 %vm208_vm2, %v206_v3  ;;  %s769_s23 = scalar_lea.vmem %s539_s11, 128  ;;  %s857_s29 = smov [#allocation5]  }
  0x32   : > { %664 = vmatpush3.msk.msra.mxu0 %vm212_vm1, %v634_v5  ;;  %668 = vmatprep.subr.mxu1 %v854_v0  ;;  %p770_p8 = scmp.ne.s32.totalorder %s539_s11, %s769_s23  ;;  %s773_s15 = sshll.u32 %s857_s29, 4  ;;  %s774_s15 = int_to_ptr.vmem [resolvable:$false] %s773_s15 }
  0x33   : > { %665 = vmatprep.mubr.msk.f32.mxu0 %vm855_vm0, %v854_v0  ;;  %669 = vmatpush3.msk.msra.mxu1 %vm212_vm1, %v637_v6  ;;  %s775_s30 = scalar_lea.vmem %s774_s15, 256  ;;  %p776_p1 = scmp.lt.s32.totalorder %s539_s11, %s774_s15 }
  0x34   : > { %670 = vmatprep.mubr.msk.f32.mxu1 %vm855_vm0, %v854_v0  ;;  %666 = vmatmul.mubr.msk.f32.vlgmr.msra.gmra.mxu0 %vm208_vm2, %v206_v3  ;;  %p771_p12 = pnand %p770_p8, %p929_p9  ;;  %p777_p3 = scmp.lt.s32.totalorder %s775_s30, %s769_s23 }
  0x35   : > { %517 = vperm.xlu0 %740, %v514_v7   ;;  %671 = vmatmul.mubr.msk.f32.vlgmr.msra.gmra.mxu1 %vm208_vm2, %v206_v3 }
  0x36   : > { %p772_p0 = pneg %p771_p12  ;;  %p778_p5 = por %p777_p3, %p776_p1 }
  0x38   : > { %p779_p6 = pnand %p778_p5, %p772_p0 }
  0xb0   : > { %v518_v17 = vpop.permute.xlu0 %517 }
  0xf0   : > { %v282_v8 = vpop.f32.mrf.mxu0 }
  0xf1   : > { %v357_v9 = vpop.f32.mrf.mxu1 }
  0xf2   : > { %v657_v10 = vpop.f32.mrf.mxu0  ;;  %v361_v11 = vmax.f32 %v282_v8, %v357_v9 }
  0xf3   : > { %v662_v12 = vpop.f32.mrf.mxu1 }
  0xf4   : > { %v433_v13 = vpop.f32.mrf.mxu0 }
  0xf5   : > { %v437_v14 = vmax.f32 %v361_v11, %v433_v13  ;;  %v509_v15 = vpop.f32.mrf.mxu1 }
  0xf6   : > { %v667_v16 = vpop.f32.mrf.mxu0 }
  0xf7   : > { %v513_v18 = vmax.f32 %v437_v14, %v509_v15  ;;  %v672_v19 = vpop.f32.mrf.mxu1 }
  0xf9   : > { %v520_v20 = vadd.f32 %v518_v17, %v513_v18 }
  0xfb   : > { %522 = vst.msk [vmem:[%s205_s10] sm:$0xff] %vm521_vm3, %v520_v20 }
  0xfc   : > { %782 = shalt.err (!%p779_p6)
}
  0xfd   : > { %s783_s4 = scalar_lea.hbm %s536_s21, 128  ;;  %s787_s6 = scalar_lea.hbm %s1032_s3, 256 }
  0xfe   : > { %p784_p7 = scmp.ne.s32.totalorder %s536_s21, %s783_s4  ;;  %p788_p13 = scmp.lt.s32.totalorder %s536_s21, %s1032_s3 }
  0xff   : > { %p789_p2 = scmp.lt.s32.totalorder %s787_s6, %s783_s4 }
 0x100   : > { %p785_p10 = pnand %p784_p7, %p929_p9 }
 0x101   : > { %p790_p8 = por %p789_p2, %p788_p13 }
 0x102   : > { %p786_p4 = pneg %p785_p10 }
 0x104   : > { %p791_p12 = pnand %p790_p8, %p786_p4 }
 0x106   : > { %794 = shalt.err (!%p791_p12)
}
 0x107   : > { %675 = dma.vmem_to_hbm [thread:$0]  (%p929_p9), %s539_s11, 128, %s536_s21, %s524_s22  }
 0x108 PF: > { %s550_s8 = sand.u32 1, %s829_s12   ;;  %p1038_p0 = scmp.ge.s32.totalorder %s849_s17, 2 }
 0x109   : > { %s551_s9 = scalar_lea.sflag [#allocation4], %s550_s8 }
 0x10a   : > { %p682_p1 = pnand %p1038_p0, %p936_p11 }
 0x10c   : > { %p683_p3 = pneg %p682_p1 }
 0x10e   : > { %824 = dma.done.wait (%p683_p3), %s551_s9, 128  }
 0x10f   : > { %826 = vsyncadd (%p683_p3), %s551_s9, 4294967168  ;;  %s19_s17 = sadd.s32 1, %s849_s17   ;;  %s1039_s12 = smov %s833_s13 }
 0x110   : > { %p16_p5 = scmp.ge.s32.totalorder %s19_s17, 4   ;;  %s1040_s13 = smov %s837_s14 }
 0x111   : > { %s1041_s14 = smov %s934_s26  ;;  %s1042_s15 = smov %s845_s16 }
 0x112   : > { %s1043_s16 = smov %s1045_s20  ;;  %18 = sbr.rel (!%p16_p5) target bundleno = 6 (0x6), region = 80 }
 0x117   :  { %556 = vsyncpa [#allocation3], 1 }
 0x118   :  { %558 = vsyncpa [#allocation3 + $0x1], 1 }
 0x119   :  { %559 = vsyncpa [#allocation4], 1 }
 0x11a   :  { %561 = vsyncpa [#allocation4 + $0x1], 1 }

</bundles_post_ra>
